<compile_context>
chip_gen: v7x
topology: tpu7x:2x2x1
jax: 0.10.0
libtpu: 0.0.40
codegen_flags: <defaults>
</compile_context>

<pallas_src>
import jax
import jax.numpy as jnp
from jax import lax
from jax.experimental import pallas as pl
from jax.experimental.pallas import tpu as pltpu


def _tpu_params():
    """Best-effort query of VMEM capacity and TensorCore count."""
    vmem_cap = 64 << 20   # conservative default (v7x per-TC VMEM)
    num_tc = 1
    try:
        info = pltpu.get_tpu_info()
        vmem_cap = int(getattr(info, "vmem_capacity_bytes", vmem_cap))
        num_tc = int(getattr(info, "num_tensorcores",
                             getattr(info, "tensorcores_per_chip", 1)))
    except Exception:
        pass
    return vmem_cap, max(num_tc, 1)


def _pick_batch_tile(n, per_batch_bytes, block_budget_bytes, num_tc=1):
    """Largest divisor of n whose x-block fits the budget.  On multi-TC chips,
    prefer tiles that give a step count divisible by the TC count so no core
    idles on the tail."""
    fits = [c for c in range(1, n + 1)
            if n % c == 0 and c * per_batch_bytes <= block_budget_bytes]
    if not fits:
        return 1
    if num_tc > 1:
        balanced = [c for c in fits if (n // c) % num_tc == 0]
        if balanced:
            return max(balanced)
    return max(fits)


def se_block_kernel(x_ref, w1_ref, w2_ref, o_ref):
    # x_ref / o_ref: (bt, C, HW)  -- C on sublanes, HW on lanes (lane-dense).
    # w1_ref: (Cr, C)  torch nn.Linear(C, Cr, bias=False) weight layout
    # w2_ref: (C, Cr)  torch nn.Linear(Cr, C, bias=False) weight layout
    x = x_ref[...]

    # ---- squeeze: global average pool, f32 accumulation -> (bt, C) ----------
    pooled = jnp.mean(x, axis=2, dtype=jnp.float32)

    # ---- excitation: FC -> ReLU -> FC -> sigmoid, row layout (bt, *) --------
    h = lax.dot_general(pooled.astype(w1_ref.dtype), w1_ref[...],
                        (((1,), (1,)), ((), ())),
                        preferred_element_type=jnp.float32)        # (bt, Cr)
    h = jnp.maximum(h, 0.0)
    z = lax.dot_general(h.astype(w2_ref.dtype), w2_ref[...],
                        (((1,), (1,)), ((), ())),
                        preferred_element_type=jnp.float32)        # (bt, C)
    s = jax.nn.sigmoid(z)                                          # EUP exp/recip

    # ---- scale: one fused broadcast-multiply-store over the whole tile ------
    o_ref[...] = (x * s[:, :, None]).astype(o_ref.dtype)


def se_block(x, w1, w2):
    """SEBlock forward.  x: (N, C, H, W); w1: (C//r, C); w2: (C, C//r)."""
    N, C, H, W = x.shape
    HW = H * W
    Cr = w1.shape[0]
    assert w1.shape == (Cr, C) and w2.shape == (C, Cr)

    x3 = x.reshape(N, C, HW)                  # free reshape, no data movement
    itemsize = x3.dtype.itemsize
    per_batch_bytes = C * HW * itemsize
    weight_bytes = 2 * C * Cr * jnp.dtype(w1.dtype).itemsize

    vmem_cap, num_tc = _tpu_params()
    # Raise the scoped VMEM limit well above the default, but stay under physical.
    vmem_limit = int(min(vmem_cap * 3 // 4, 100 << 20))
    # x and out blocks are each double-buffered -> ~4x block resident, plus weights.
    block_budget = max(per_batch_bytes,
                       min((vmem_limit - 2 * weight_bytes - (2 << 20)) // 4,
                           12 << 20))
    bt = _pick_batch_tile(N, per_batch_bytes, block_budget, num_tc)

    cost = pl.CostEstimate(
        flops=2 * N * C * HW + 4 * N * C * Cr,
        bytes_accessed=2 * N * C * HW * itemsize + weight_bytes,
        transcendentals=N * C,
    )

    out = pl.pallas_call(
        se_block_kernel,
        out_shape=jax.ShapeDtypeStruct((N, C, HW), x.dtype),
        grid=(N // bt,),
        in_specs=[
            pl.BlockSpec((bt, C, HW), lambda i: (i, 0, 0)),
            pl.BlockSpec((Cr, C), lambda i: (0, 0)),
            pl.BlockSpec((C, Cr), lambda i: (0, 0)),
        ],
        out_specs=pl.BlockSpec((bt, C, HW), lambda i: (i, 0, 0)),
        compiler_params=pltpu.CompilerParams(
            dimension_semantics=("parallel",),
            vmem_limit_bytes=vmem_limit),
        cost_estimate=cost,
    )(x3, w1, w2)
    return out.reshape(N, C, H, W)


if __name__ == "__main__":
    import math

    key = jax.random.PRNGKey(0)
    kx, k1, k2 = jax.random.split(key, 3)

    # Small shapes consistent with the module: reduction=16 requires C >= 16.
    N, C, H, W = 2, 64, 16, 16
    reduction = 16
    Cr = C // reduction

    x = jax.random.normal(kx, (N, C, H, W), jnp.float32)
    # torch nn.Linear default init: U(-1/sqrt(fan_in), 1/sqrt(fan_in)), bias=False.
    b1 = 1.0 / math.sqrt(C)
    b2 = 1.0 / math.sqrt(Cr)
    w1 = jax.random.uniform(k1, (Cr, C), jnp.float32, -b1, b1)   # Linear(C, Cr)
    w2 = jax.random.uniform(k2, (C, Cr), jnp.float32, -b2, b2)   # Linear(Cr, C)

    out = se_block(x, w1, w2)
    out = jax.block_until_ready(out)

    # Pure-JAX reference of the same forward pass.
    pooled = jnp.mean(x, axis=(2, 3))                            # (N, C)
    h = jnp.maximum(pooled @ w1.T, 0.0)
    s = jax.nn.sigmoid(h @ w2.T)                                 # (N, C)
    ref = x * s[:, :, None, None]

    assert out.shape == (N, C, H, W), out.shape
    assert bool(jnp.isfinite(out).all())
    max_err = float(jnp.max(jnp.abs(out - ref)))
    assert max_err < 1e-2, max_err
    print("KERNEL_OK")
</pallas_src>

<mosaic_0001>
module attributes {stable_mosaic.version = 11 : i64} {
  func.func @se_block_kernel(%arg0: i32, %arg1: memref<2x64x256xf32, #tpu.memory_space<vmem>>, %arg2: memref<4x64xf32, #tpu.memory_space<vmem>>, %arg3: memref<64x4xf32, #tpu.memory_space<vmem>>, %arg4: memref<2x64x256xf32, #tpu.memory_space<vmem>>) attributes {dimension_semantics = [#tpu.dimension_semantics<parallel>], iteration_bounds = array<i64: 1>, scalar_prefetch = 0 : i64, scratch_operands = 0 : i64, tpu.core_type = #tpu.core_type<tc>, window_params = [{transform_indices = @transform_0, window_bounds = array<i64: 2, 64, 256>}, {pipeline_mode = #tpu.pipeline_mode<synchronous>, transform_indices = @transform_1, window_bounds = array<i64: 4, 64>}, {pipeline_mode = #tpu.pipeline_mode<synchronous>, transform_indices = @transform_2, window_bounds = array<i64: 64, 4>}, {transform_indices = @transform_3, window_bounds = array<i64: 2, 64, 256>}]} {
    %c0 = arith.constant 0 : index
    %c0_0 = arith.constant 0 : index
    %c0_1 = arith.constant 0 : index
    %0 = vector.load %arg1[%c0, %c0_0, %c0_1] : memref<2x64x256xf32, #tpu.memory_space<vmem>>, vector<2x64x256xf32>
    %cst = arith.constant dense<0.000000e+00> : vector<2x64xf32>
    %1 = vector.multi_reduction <add>, %0, %cst [2] : vector<2x64x256xf32> to vector<2x64xf32>
    %cst_2 = arith.constant 2.560000e+02 : f32
    %2 = vector.broadcast %cst_2 : f32 to vector<2x64xf32>
    %3 = arith.divf %1, %2 : vector<2x64xf32>
    %c0_3 = arith.constant 0 : index
    %c0_4 = arith.constant 0 : index
    %4 = vector.load %arg2[%c0_3, %c0_4] : memref<4x64xf32, #tpu.memory_space<vmem>>, vector<4x64xf32>
    %cst_5 = arith.constant dense<0.000000e+00> : vector<2x4xf32>
    %5 = tpu.matmul %3, %4, %cst_5 {dimension_numbers = #tpu.dot_dimension_numbers<[1], [1], [0], [0], [0, 0, 1, 0], [], []>} : vector<2x64xf32>, vector<4x64xf32>, vector<2x4xf32> -> vector<2x4xf32>
    %cst_6 = arith.constant 0.000000e+00 : f32
    %6 = vector.broadcast %cst_6 : f32 to vector<2x4xf32>
    %7 = arith.maximumf %5, %6 : vector<2x4xf32>
    %c0_7 = arith.constant 0 : index
    %c0_8 = arith.constant 0 : index
    %8 = vector.load %arg3[%c0_7, %c0_8] : memref<64x4xf32, #tpu.memory_space<vmem>>, vector<64x4xf32>
    %cst_9 = arith.constant dense<0.000000e+00> : vector<2x64xf32>
    %9 = tpu.matmul %7, %8, %cst_9 {dimension_numbers = #tpu.dot_dimension_numbers<[1], [1], [0], [0], [0, 0, 1, 0], [], []>} : vector<2x4xf32>, vector<64x4xf32>, vector<2x64xf32> -> vector<2x64xf32>
    %10 = arith.negf %9 : vector<2x64xf32>
    %11 = math.exp %10 : vector<2x64xf32>
    %cst_10 = arith.constant 1.000000e+00 : f32
    %12 = vector.broadcast %cst_10 : f32 to vector<2x64xf32>
    %13 = arith.addf %12, %11 : vector<2x64xf32>
    %14 = arith.divf %12, %13 : vector<2x64xf32>
    %15 = vector.shape_cast %14 : vector<2x64xf32> to vector<2x64x1xf32>
    %16 = vector.broadcast %15 : vector<2x64x1xf32> to vector<2x64x256xf32>
    %17 = arith.mulf %0, %16 : vector<2x64x256xf32>
    %c0_11 = arith.constant 0 : index
    %c0_12 = arith.constant 0 : index
    %c0_13 = arith.constant 0 : index
    %18 = vector.load %arg4[%c0_11, %c0_12, %c0_13] : memref<2x64x256xf32, #tpu.memory_space<vmem>>, vector<2x64x256xf32>
    tpu.vector_store %arg4[%c0_11, %c0_12, %c0_13], %17 {strides = array<i32>} : memref<2x64x256xf32, #tpu.memory_space<vmem>>, vector<2x64x256xf32>,
    return
  }
  func.func @transform_0(%arg0: i32) -> (i32, i32, i32) {
    %c0_i32 = arith.constant 0 : i32
    %c0_i32_0 = arith.constant 0 : i32
    %c0_i32_1 = arith.constant 0 : i32
    return %arg0, %c0_i32, %c0_i32_0 : i32, i32, i32
  }
  func.func @transform_1(%arg0: i32) -> (i32, i32) {
    %c0_i32 = arith.constant 0 : i32
    %c0_i32_0 = arith.constant 0 : i32
    %c0_i32_1 = arith.constant 0 : i32
    return %c0_i32, %c0_i32_0 : i32, i32
  }
  func.func @transform_2(%arg0: i32) -> (i32, i32) {
    %c0_i32 = arith.constant 0 : i32
    %c0_i32_0 = arith.constant 0 : i32
    %c0_i32_1 = arith.constant 0 : i32
    return %c0_i32, %c0_i32_0 : i32, i32
  }
  func.func @transform_3(%arg0: i32) -> (i32, i32, i32) {
    %c0_i32 = arith.constant 0 : i32
    %c0_i32_0 = arith.constant 0 : i32
    %c0_i32_1 = arith.constant 0 : i32
    return %arg0, %c0_i32, %c0_i32_0 : i32, i32, i32
  }
}

</mosaic_0001>

<bundles_post_ra>
// kernel: tpu_custom_call.1
= control target key start
LH: loop header
LB: loop body
LE: loop exit
PB: predicated region body
PF: predicated region fallthrough
CT: control target
= control target key end

     0   :  { %8 = vsyncpa [#allocation3], 0  ;;  %s954_s0 = inlined_call_operand.hbm [shape: f32[2,64,256], index: 0, kind: input, shape index: {}]   ;;  %s955_s1 = inlined_call_operand.vmem [shape: f32[4,64], index: 1, kind: input, shape index: {}]   ;;  %s956_s2 = inlined_call_operand.vmem [shape: f32[64,4], index: 2, kind: input, shape index: {}]   ;;  %s957_s3 = inlined_call_operand.hbm [shape: f32[2,64,256], index: 3, kind: output, shape index: {}]  }
   0x1   :  { %9 = vsyncpa [#allocation4], 0  ;;  %s701_s12 = smov [#allocation2]   ;;  %s653_s16 = scalar_lea.hbm %s954_s0, 4096 }
   0x2   :  { %s15_s13 = sshll.u32 %s701_s12, 4  ;;  %p654_p0 = scmp.ne.s32.totalorder %s954_s0, %s653_s16  ;;  %s16_s13 = int_to_ptr.vmem [resolvable:$true] %s15_s13 }
   0x3   :  { %p657_p1 = scmp.lt.u32.totalorder %s653_s16, %s954_s0 }
   0x5   :  { %p659_p2 = pnand %p657_p1, %p654_p0 }
   0x7   :  { %662 = shalt.err (!%p659_p2)
}
   0x8   :  { %s663_s21 = scalar_lea.vmem %s16_s13, 4096  ;;  %p668_p4 = scmp.lt.s32.totalorder %s16_s13, %s16_s13 }
   0x9   :  { %p664_p3 = scmp.ne.s32.totalorder %s16_s13, %s663_s21  ;;  %p669_p5 = scmp.lt.s32.totalorder %s663_s21, %s663_s21 }
   0xb   :  { %p670_p6 = por %p669_p5, %p668_p4 }
   0xd   :  { %p671_p7 = pnand %p670_p6, %p664_p3 }
   0xf   :  { %674 = shalt.err (!%p671_p7)
}
  0x10   :  { %s702_s22 = smov 256   ;;  %s703_s23 = smov 16  }
  0x11   :  { %21 = dma.hbm_to_vmem [thread:$0]  %s954_s0, 4096, %s16_s13, [#allocation3], %s702_s22, %s702_s22, %s703_s23  }
  0x12   :  { %697 = dma.done.wait [#allocation3], 4096  }
  0x13   :  { %698 = vsyncadd [#allocation3], 4294963200  ;;  %v743_v0 = vld [vmem:[#allocation2 + $0x80] sm:$0xff]  ;;  %v745_v1 = vld [vmem:[#allocation2 + $0x88] sm:$0xff]  ;;  %v704_v48 = vmov 0.0   ;;  %vm239_vm0 = vcmask 523264  }
  0x14   :  { %v747_v2 = vld [vmem:[#allocation2] sm:$0xff]  ;;  %v85_v3 = vadd.f32 %v745_v1, %v743_v0  ;;  %v751_v4 = vld [vmem:[#allocation2 + $0x8] sm:$0xff]  ;;  %v753_v5 = vld [vmem:[#allocation2 + $0x90] sm:$0xff]  ;;  %602 = vmatprep.subr.mxu0 %v704_v48  ;;  %vm705_vm1 = vmmov 0   ;;  %vm324_vm2 = vcmask 31744   ;;  %v706_v52 = vmov 0.0|0.0  }
  0x15   :  { %v755_v6 = vld [vmem:[#allocation2 + $0x98] sm:$0xff]  ;;  %v61_v7 = vadd.f32 %v751_v4, %v747_v2  ;;  %v759_v8 = vld [vmem:[#allocation2 + $0x10] sm:$0xff]  ;;  %v767_v12 = vld [vmem:[#allocation2 + $0xa0] sm:$0xff]  ;;  %604 = vmatprep.mubr.msk.f32.mxu0 %vm705_vm1, %v704_v48  ;;  %623 = vmatprep.mubr.msk.f32.mxu1 %vm705_vm1, %v704_v48  ;;  %vm154_vm4 = vcmask 130112   ;;  %vm161_vm5 = vcmask 195712   ;;  %vm168_vm6 = vcmask 261312  }
  0x16   :  { %v761_v9 = vld [vmem:[#allocation2 + $0x18] sm:$0xff]  ;;  %86 = vadd.xlane.f32.xlu1 %v85_v3  ;;  %v88_v10 = vadd.f32 %v755_v6, %v753_v5  ;;  %v769_v13 = vld [vmem:[#allocation2 + $0xa8] sm:$0xff]  ;;  %v771_v14 = vld [vmem:[#allocation2 + $0x20] sm:$0xff]  ;;  %626 = vmatprep.subr.bf16.mxu1 %v706_v52  ;;  %vm175_vm7 = vcmask 326912   ;;  %vm182_vm8 = vcmask 392512   ;;  %vm189_vm9 = vcmask 458112  }
  0x17   :  { %62 = vadd.xlane.f32.xlu0 %v61_v7  ;;  %v64_v11 = vadd.f32 %v761_v9, %v759_v8  ;;  %v773_v15 = vld [vmem:[#allocation2 + $0x28] sm:$0xff]  ;;  %v91_v16 = vadd.f32 %v769_v13, %v767_v12  ;;  %v779_v18 = vld [vmem:[#allocation2 + $0xb0] sm:$0xff]  ;;  %v781_v19 = vld [vmem:[#allocation2 + $0xb8] sm:$0xff]  ;;  %vm196_vm10 = vcmask 523712   ;;  %vm237_vm11 = vcmask 1041409  }
  0x18   :  { %v67_v17 = vadd.f32 %v773_v15, %v771_v14  ;;  %965 = vst [vmem:[#allocation8_spill] sm:$0xff] %v781_v19  ;;  %v783_v20 = vld [vmem:[#allocation2 + $0x30] sm:$0xff]  ;;  %v785_v21 = vld [vmem:[#allocation2 + $0x38] sm:$0xff]  ;;  %v94_v22 = vadd.f32 %v781_v19, %v779_v18  ;;  %v791_v24 = vld [vmem:[#allocation2 + $0xc0] sm:$0xff] }
  0x19   :  { %v70_v23 = vadd.f32 %v785_v21, %v783_v20  ;;  %v793_v25 = vld [vmem:[#allocation2 + $0xc8] sm:$0xff]  ;;  %v795_v26 = vld [vmem:[#allocation2 + $0x40] sm:$0xff]  ;;  %v803_v30 = vld [vmem:[#allocation2 + $0xd0] sm:$0xff] }
  0x1a   :  { %89 = vadd.xlane.f32.xlu1 %v88_v10  ;;  %v797_v27 = vld [vmem:[#allocation2 + $0x48] sm:$0xff]  ;;  %v97_v28 = vadd.f32 %v793_v25, %v791_v24  ;;  %966 = vst [vmem:[#allocation9_spill] sm:$0xff] %v803_v30  ;;  %v805_v31 = vld [vmem:[#allocation2 + $0xd8] sm:$0xff]  ;;  %v807_v32 = vld [vmem:[#allocation2 + $0x50] sm:$0xff] }
  0x1b   :  { %65 = vadd.xlane.f32.xlu0 %v64_v11  ;;  %v73_v29 = vadd.f32 %v797_v27, %v795_v26  ;;  %967 = vst [vmem:[#allocation10_spill] sm:$0xff] %v805_v31  ;;  %v809_v33 = vld [vmem:[#allocation2 + $0x58] sm:$0xff]  ;;  %v100_v34 = vadd.f32 %v805_v31, %v803_v30  ;;  %v815_v36 = vld [vmem:[#allocation2 + $0xe0] sm:$0xff]  ;;  %v817_v37 = vld [vmem:[#allocation2 + $0xe8] sm:$0xff] }
  0x1c   :  { %v76_v35 = vadd.f32 %v809_v33, %v807_v32  ;;  %968 = vst [vmem:[#allocation11_spill] sm:$0xff] %v815_v36  ;;  %969 = vst [vmem:[#allocation12_spill] sm:$0xff] %v817_v37  ;;  %v819_v38 = vld [vmem:[#allocation2 + $0x60] sm:$0xff]  ;;  %v821_v39 = vld [vmem:[#allocation2 + $0x68] sm:$0xff]  ;;  %v103_v40 = vadd.f32 %v817_v37, %v815_v36 }
  0x1d   :  { %v79_v41 = vadd.f32 %v821_v39, %v819_v38  ;;  %v827_v42 = vld [vmem:[#allocation2 + $0xf0] sm:$0xff]  ;;  %v829_v43 = vld [vmem:[#allocation2 + $0xf8] sm:$0xff]  ;;  %v126_v49 = vld [vmem:[%s955_s1] sm:$0xf] }
  0x1e   :  { %92 = vadd.xlane.f32.xlu1 %v91_v16  ;;  %970 = vst [vmem:[#allocation13_spill] sm:$0xff] %v827_v42  ;;  %971 = vst [vmem:[#allocation14_spill] sm:$0xff] %v829_v43  ;;  %v831_v44 = vld [vmem:[#allocation2 + $0x70] sm:$0xff]  ;;  %v833_v45 = vld [vmem:[#allocation2 + $0x78] sm:$0xff]  ;;  %v106_v46 = vadd.f32 %v829_v43, %v827_v42  ;;  %603 = vmatpush3.xpose.msk.msra.mxu0 %vm239_vm0, %v126_v49  ;;  %v143_v16 = vlaneseq }
  0x1f   :  { %68 = vadd.xlane.f32.xlu0 %v67_v17  ;;  %v82_v47 = vadd.f32 %v833_v45, %v831_v44  ;;  %v316_v50 = vld [vmem:[%s956_s2] sm:$0xff]  ;;  %v317_v51 = vld [vmem:[%s956_s2 + $0x8] sm:$0xff]  ;;  %vm851_vm3 = vmpackc.low %vm324_vm2, %vm324_vm2 }
  0x20   :  { %v627_v53 = vpack.c.bf16 %v317_v51, %v316_v50  ;;  %v318_v55 = vld [vmem:[%s956_s2 + $0x10] sm:$0xff]  ;;  %v319_v56 = vld [vmem:[%s956_s2 + $0x18] sm:$0xff]  ;;  %v320_v58 = vld [vmem:[%s956_s2 + $0x20] sm:$0xff] }
  0x21   :  { %v631_v57 = vpack.c.bf16 %v319_v56, %v318_v55  ;;  %v321_v59 = vld [vmem:[%s956_s2 + $0x28] sm:$0xff]  ;;  %v322_v61 = vld [vmem:[%s956_s2 + $0x30] sm:$0xff]  ;;  %v323_v62 = vld [vmem:[%s956_s2 + $0x38] sm:$0xff]  ;;  %s707_s2 = smov [#allocation5]  }
  0x22   :  { %95 = vadd.xlane.f32.xlu1 %v94_v22  ;;  %629 = vmatpush3.bf16.xpose.msk.msra.mxu1 %vm851_vm3, %v627_v53  ;;  %v635_v60 = vpack.c.bf16 %v321_v59, %v320_v58  ;;  %v639_v63 = vpack.c.bf16 %v323_v62, %v322_v61  ;;  %s567_s15 = sshll.u32 %s707_s2, 4  ;;  %s568_s15 = int_to_ptr.vmem [resolvable:$true] %s567_s15 }
  0x23   :  { %71 = vadd.xlane.f32.xlu0 %v70_v23  ;;  %630 = vmatprep.subr.bf16.mxu1 %v706_v52  ;;  %v144_v23 = vand.u32 127, %v143_v16  ;;  %s675_s16 = scalar_lea.vmem %s568_s15, 4096  ;;  %p680_p9 = scmp.lt.s32.totalorder %s568_s15, %s568_s15 }
  0x24   :  { %p676_p8 = scmp.ne.s32.totalorder %s568_s15, %s675_s16  ;;  %p681_p10 = scmp.lt.s32.totalorder %s675_s16, %s675_s16 }
  0x25   :  { %v177_v48 = vadd.s32 4294967256, %v144_v23  ;;  %v184_v53 = vadd.s32 4294967248, %v144_v23 }
  0x26   :  { %98 = vadd.xlane.f32.xlu1 %v97_v28  ;;  %p682_p11 = por %p681_p10, %p680_p9 }
  0x27   :  { %74 = vadd.xlane.f32.xlu0 %v73_v29  ;;  %v881_v29 = vshrl.u32 %v143_v16, 7 }
  0x28   :  { %p683_p12 = pnand %p682_p11, %p676_p8 }
  0x29   :  { %v147_v49 = vsub.s32 %v144_v23, %v881_v29  ;;  %v180_v59 = vsub.s32 %v177_v48, %v881_v29 }
  0x2a   :  { %101 = vadd.xlane.f32.xlu1 %v100_v34  ;;  %633 = vmatpush3.bf16.xpose.msk.msra.mxu1 %vm851_vm3, %v631_v57 }
  0x2b   :  { %77 = vadd.xlane.f32.xlu0 %v76_v35  ;;  %634 = vmatprep.subr.bf16.mxu1 %v706_v52  ;;  %v149_v35 = vadd.s32 4294967288, %v144_v23 }
  0x2d   :  { %v152_v51 = vsub.s32 %v149_v35, %v881_v29 }
  0x2e   :  { %104 = vadd.xlane.f32.xlu1 %v103_v40  ;;  %v156_v40 = vadd.s32 4294967280, %v144_v23 }
  0x2f   :  { %80 = vadd.xlane.f32.xlu0 %v79_v41  ;;  %v163_v41 = vadd.s32 4294967272, %v144_v23 }
  0x31   :  { %v166_v55 = vsub.s32 %v163_v41, %v881_v29 }
  0x32   :  { %107 = vadd.xlane.f32.xlu1 %v106_v46  ;;  %637 = vmatpush3.bf16.xpose.msk.msra.mxu1 %vm851_vm3, %v635_v60  ;;  %v170_v46 = vadd.s32 4294967264, %v144_v23 }
  0x33   :  { %83 = vadd.xlane.f32.xlu0 %v82_v47  ;;  %638 = vmatprep.subr.bf16.mxu1 %v706_v52  ;;  %v159_v52 = vsub.s32 %v156_v40, %v881_v29 }
  0x34   :  { %v173_v56 = vsub.s32 %v170_v46, %v881_v29  ;;  %v191_v46 = vadd.s32 4294967240, %v144_v23 }
  0x36   :  { %v194_v23 = vsub.s32 %v191_v46, %v881_v29 }
  0x3a   :  { %641 = vmatpush3.bf16.xpose.msk.msra.mxu1 %vm851_vm3, %v639_v63 }
  0xa3   :  { %v87_v3 = vpop.xlane.xlu1 %86 }
  0xa4   :  { %v63_v7 = vpop.xlane.xlu0 %62  ;;  %v118_v61 = vmul.f32 0.00390625, %v87_v3 }
  0xa5   :  { %v110_v35 = vmul.f32 0.00390625, %v63_v7 }
  0xa6   :  { %v201_v37 = vrot.slane %v118_v61, %v147_v49 }
  0xa7   :  { %v90_v10 = vpop.xlane.xlu1 %89  ;;  %v148_v19 = vrot.slane %v110_v35, %v147_v49 }
  0xa8   :  { %v66_v11 = vpop.xlane.xlu0 %65  ;;  %v119_v54 = vmul.f32 0.00390625, %v90_v10  ;;  %v187_v10 = vsub.s32 %v184_v53, %v881_v29 }
  0xa9   :  { %v111_v57 = vmul.f32 0.00390625, %v66_v11 }
  0xaa   :  { %v205_v41 = vrot.slane %v119_v54, %v152_v51 }
  0xab   :  { %v93_v17 = vpop.xlane.xlu1 %92  ;;  %v153_v11 = vrot.slane %v111_v57, %v152_v51 }
  0xac   :  { %v69_v22 = vpop.xlane.xlu0 %68  ;;  %v120_v58 = vmul.f32 0.00390625, %v93_v17  ;;  %v206_v53 = vsel %vm154_vm4, %v205_v41, %v201_v37 }
  0xad   :  { %v112_v62 = vmul.f32 0.00390625, %v69_v22  ;;  %v155_v51 = vsel %vm154_vm4, %v153_v11, %v148_v19 }
  0xae   :  { %v210_v17 = vrot.slane %v120_v58, %v159_v52 }
  0xaf   :  { %v96_v28 = vpop.xlane.xlu1 %95  ;;  %v160_v3 = vrot.slane %v112_v62, %v159_v52 }
  0xb0   :  { %v72_v34 = vpop.xlane.xlu0 %71  ;;  %v121_v63 = vmul.f32 0.00390625, %v96_v28  ;;  %v211_v57 = vsel %vm161_vm5, %v210_v17, %v206_v53  ;;  %v465_v53 = vsub.s32 1, %v881_v29 }
  0xb1   :  { %v113_v40 = vmul.f32 0.00390625, %v72_v34  ;;  %v162_v61 = vsel %vm161_vm5, %v160_v3, %v155_v51 }
  0xb2   :  { %v215_v22 = vrot.slane %v121_v63, %v166_v55 }
  0xb3   :  { %v99_v47 = vpop.xlane.xlu1 %98  ;;  %v167_v7 = vrot.slane %v113_v40, %v166_v55 }
  0xb4   :  { %v75_v50 = vpop.xlane.xlu0 %74  ;;  %v122_v43 = vmul.f32 0.00390625, %v99_v47  ;;  %v216_v49 = vsel %vm168_vm6, %v215_v22, %v211_v57 }
  0xb5   :  { %v114_v42 = vmul.f32 0.00390625, %v75_v50  ;;  %v169_v37 = vsel %vm168_vm6, %v167_v7, %v162_v61  ;;  %v430_v7 = vsub.s32 0, %v881_v29 }
  0xb6   :  { %v220_v34 = vrot.slane %v122_v43, %v173_v56 }
  0xb7   :  { %v102_v60 = vpop.xlane.xlu1 %101  ;;  %v174_v54 = vrot.slane %v114_v42, %v173_v56 }
  0xb8   :  { %v78_v16 = vpop.xlane.xlu0 %77  ;;  %v123_v31 = vmul.f32 0.00390625, %v102_v60 }
  0xb9   :  { %v115_v30 = vmul.f32 0.00390625, %v78_v16  ;;  %v176_v19 = vsel %vm175_vm7, %v174_v54, %v169_v37 }
  0xba   :  { %v225_v50 = vrot.slane %v123_v31, %v180_v59  ;;  %v221_v31 = vsel %vm175_vm7, %v220_v34, %v216_v49 }
  0xbb   :  { %v105_v48 = vpop.xlane.xlu1 %104  ;;  %v181_v58 = vrot.slane %v115_v30, %v180_v59 }
  0xbc   :  { %v124_v28 = vmul.f32 0.00390625, %v105_v48  ;;  %v81_v36 = vpop.xlane.xlu0 %80  ;;  %v226_v56 = vsel %vm182_vm8, %v225_v50, %v221_v31 }
  0xbd   :  { %v116_v47 = vmul.f32 0.00390625, %v81_v36  ;;  %v183_v59 = vsel %vm182_vm8, %v181_v58, %v176_v19 }
  0xbe   :  { %v230_v60 = vrot.slane %v124_v28, %v187_v10 }
  0xbf   :  { %v108_v52 = vpop.xlane.xlu1 %107  ;;  %v188_v55 = vrot.slane %v116_v47, %v187_v10 }
  0xc0   :  { %v125_v43 = vmul.f32 0.00390625, %v108_v52  ;;  %v84_v36 = vpop.xlane.xlu0 %83  ;;  %v231_v62 = vsel %vm189_vm9, %v230_v60, %v226_v56 }
  0xc1   :  { %v117_v42 = vmul.f32 0.00390625, %v84_v36  ;;  %v190_v16 = vsel %vm189_vm9, %v188_v55, %v183_v59  ;;  %v974_v59 = vld [vmem:[#allocation8_spill] sm:$0xff] }
  0xc2   :  { %v235_v30 = vrot.slane %v125_v43, %v194_v23 }
  0xc3   :  { %v195_v63 = vrot.slane %v117_v42, %v194_v23 }
  0xc4   :  { %v236_v35 = vsel %vm196_vm10, %v235_v30, %v231_v62 }
  0xc5   :  { %v197_v40 = vsel %vm196_vm10, %v195_v63, %v190_v16  ;;  %v975_v63 = vld [vmem:[#allocation11_spill] sm:$0xff] }
  0xc6   :  { %v238_v10 = vsel %vm237_vm11, %v236_v35, %v197_v40  ;;  %v976_v35 = vld [vmem:[#allocation12_spill] sm:$0xff]  ;;  %v978_v40 = vld [vmem:[#allocation10_spill] sm:$0xff] }
  0xc7   :  { %605 = vmatmul.mubr.msk.f32.vlgmr.msra.gmra.mrb[0].mxu0 %vm239_vm0, %v238_v10 }
 0x19a   :  { %v311_v41 = vpop.f32.mrb[0].mxu0 }
 0x19b   :  { %v315_v46 = vmax.f32 %v311_v41, 0.0  ;;  %v606_v11 = vpop.f32.mrb[1].mxu0  ;;  %v979_v41 = vld [vmem:[#allocation13_spill] sm:$0xff] }
 0x19c   :  { %v980_v11 = vld [vmem:[#allocation14_spill] sm:$0xff] }
 0x19d   :  { %624 = vmatmul.mubr.msk.f32.vlgmr.msra.gmra.mrb[0].mxu1 %vm324_vm2, %v315_v46 }
 0x270   :  { %v418_v17 = vpop.f32.mrb[0].mxu1 }
 0x271   :  { %v590_v48 = vmul.f32 -1.442695, %v418_v17  ;;  %v625_v3 = vpop.f32.mrb[1].mxu1 }
 0x273   :  { %649 = vpow2.f32 %v590_v48 }
 0x27d   :  { %v650_v22 = vpop.eup %649 }
 0x27e   :  { %v425_v28 = vadd.f32 1.0, %v650_v22 }
 0x280   :  { %651 = vrcp.f32 %v425_v28 }
 0x28a   :  { %v652_v34 = vpop.eup %651 }
 0x28b   :  { %v431_v47 = vrot.slane %v652_v34, %v430_v7  ;;  %v466_v54 = vrot.slane %v652_v34, %v465_v53 }
 0x28d   :  { %437 = vbcast.lane.b32.xlu1 %v431_v47, 264  ;;  %433 = vbcast.lane.b32.xlu0 %v431_v47, 256 }
 0x291   :  { %441 = vbcast.lane.b32.xlu1 %v431_v47, 272  ;;  %449 = vbcast.lane.b32.xlu0 %v431_v47, 288 }
 0x295   :  { %445 = vbcast.lane.b32.xlu1 %v431_v47, 280  ;;  %457 = vbcast.lane.b32.xlu0 %v431_v47, 304 }
 0x299   :  { %453 = vbcast.lane.b32.xlu1 %v431_v47, 296  ;;  %468 = vbcast.lane.b32.xlu0 %v466_v54, 256 }
 0x29d   :  { %461 = vbcast.lane.b32.xlu1 %v431_v47, 312  ;;  %476 = vbcast.lane.b32.xlu0 %v466_v54, 272 }
 0x2a1   :  { %472 = vbcast.lane.b32.xlu1 %v466_v54, 264  ;;  %484 = vbcast.lane.b32.xlu0 %v466_v54, 288 }
 0x2a5   :  { %480 = vbcast.lane.b32.xlu1 %v466_v54, 280  ;;  %492 = vbcast.lane.b32.xlu0 %v466_v54, 304 }
 0x2a9   :  { %488 = vbcast.lane.b32.xlu1 %v466_v54, 296 }
 0x2ad   :  { %496 = vbcast.lane.b32.xlu1 %v466_v54, 312 }
 0x2ff   :  { %v438_v50 = vpop.permute.xlu1 %437  ;;  %v434_v23 = vpop.permute.xlu0 %433 }
 0x300   :  { %v500_v51 = vmul.f32 %v438_v50, %v759_v8  ;;  %v501_v57 = vmul.f32 %v438_v50, %v761_v9  ;;  %v498_v29 = vmul.f32 %v434_v23, %v747_v2  ;;  %v499_v58 = vmul.f32 %v434_v23, %v751_v4 }
 0x302   :  { %532 = vst [vmem:[#allocation5 + $0x10] sm:$0xff] %v500_v51  ;;  %533 = vst [vmem:[#allocation5 + $0x18] sm:$0xff] %v501_v57 }
 0x303   :  { %530 = vst [vmem:[#allocation5] sm:$0xff] %v498_v29  ;;  %531 = vst [vmem:[#allocation5 + $0x8] sm:$0xff] %v499_v58  ;;  %v442_v60 = vpop.permute.xlu1 %441  ;;  %v450_v52 = vpop.permute.xlu0 %449 }
 0x304   :  { %v502_v61 = vmul.f32 %v442_v60, %v771_v14  ;;  %v503_v49 = vmul.f32 %v442_v60, %v773_v15  ;;  %v506_v55 = vmul.f32 %v450_v52, %v795_v26  ;;  %v507_v8 = vmul.f32 %v450_v52, %v797_v27 }
 0x306   :  { %534 = vst [vmem:[#allocation5 + $0x20] sm:$0xff] %v502_v61  ;;  %535 = vst [vmem:[#allocation5 + $0x28] sm:$0xff] %v503_v49 }
 0x307   :  { %538 = vst [vmem:[#allocation5 + $0x40] sm:$0xff] %v506_v55  ;;  %539 = vst [vmem:[#allocation5 + $0x48] sm:$0xff] %v507_v8  ;;  %v446_v2 = vpop.permute.xlu1 %445  ;;  %v458_v4 = vpop.permute.xlu0 %457 }
 0x308   :  { %v504_v9 = vmul.f32 %v446_v2, %v783_v20  ;;  %v505_v43 = vmul.f32 %v446_v2, %v785_v21  ;;  %v510_v36 = vmul.f32 %v458_v4, %v819_v38  ;;  %v511_v14 = vmul.f32 %v458_v4, %v821_v39 }
 0x30a   :  { %536 = vst [vmem:[#allocation5 + $0x30] sm:$0xff] %v504_v9  ;;  %537 = vst [vmem:[#allocation5 + $0x38] sm:$0xff] %v505_v43 }
 0x30b   :  { %542 = vst [vmem:[#allocation5 + $0x60] sm:$0xff] %v510_v36  ;;  %543 = vst [vmem:[#allocation5 + $0x68] sm:$0xff] %v511_v14  ;;  %v454_v15 = vpop.permute.xlu1 %453  ;;  %v469_v26 = vpop.permute.xlu0 %468 }
 0x30c   :  { %v508_v27 = vmul.f32 %v454_v15, %v807_v32  ;;  %v509_v37 = vmul.f32 %v454_v15, %v809_v33  ;;  %v514_v31 = vmul.f32 %v469_v26, %v743_v0  ;;  %v515_v20 = vmul.f32 %v469_v26, %v745_v1 }
 0x30e   :  { %540 = vst [vmem:[#allocation5 + $0x50] sm:$0xff] %v508_v27  ;;  %541 = vst [vmem:[#allocation5 + $0x58] sm:$0xff] %v509_v37 }
 0x30f   :  { %546 = vst [vmem:[#allocation5 + $0x80] sm:$0xff] %v514_v31  ;;  %547 = vst [vmem:[#allocation5 + $0x88] sm:$0xff] %v515_v20  ;;  %v462_v21 = vpop.permute.xlu1 %461  ;;  %v477_v38 = vpop.permute.xlu0 %476 }
 0x310   :  { %v512_v39 = vmul.f32 %v462_v21, %v831_v44  ;;  %v513_v42 = vmul.f32 %v462_v21, %v833_v45  ;;  %v518_v19 = vmul.f32 %v477_v38, %v767_v12  ;;  %v519_v32 = vmul.f32 %v477_v38, %v769_v13 }
 0x312   :  { %544 = vst [vmem:[#allocation5 + $0x70] sm:$0xff] %v512_v39  ;;  %545 = vst [vmem:[#allocation5 + $0x78] sm:$0xff] %v513_v42 }
 0x313   :  { %550 = vst [vmem:[#allocation5 + $0xa0] sm:$0xff] %v518_v19  ;;  %551 = vst [vmem:[#allocation5 + $0xa8] sm:$0xff] %v519_v32  ;;  %v473_v0 = vpop.permute.xlu1 %472  ;;  %v485_v1 = vpop.permute.xlu0 %484 }
 0x314   :  { %v516_v33 = vmul.f32 %v473_v0, %v753_v5  ;;  %v517_v56 = vmul.f32 %v473_v0, %v755_v6  ;;  %v522_v30 = vmul.f32 %v485_v1, %v791_v24  ;;  %v523_v44 = vmul.f32 %v485_v1, %v793_v25  ;;  %v977_v24 = vld [vmem:[#allocation9_spill] sm:$0xff] }
 0x316   :  { %548 = vst [vmem:[#allocation5 + $0x90] sm:$0xff] %v516_v33  ;;  %549 = vst [vmem:[#allocation5 + $0x98] sm:$0xff] %v517_v56 }
 0x317   :  { %554 = vst [vmem:[#allocation5 + $0xc0] sm:$0xff] %v522_v30  ;;  %555 = vst [vmem:[#allocation5 + $0xc8] sm:$0xff] %v523_v44  ;;  %v481_v12 = vpop.permute.xlu1 %480  ;;  %v493_v13 = vpop.permute.xlu0 %492 }
 0x318   :  { %v520_v45 = vmul.f32 %v481_v12, %v779_v18  ;;  %v521_v62 = vmul.f32 %v481_v12, %v974_v59  ;;  %v526_v16 = vmul.f32 %v493_v13, %v975_v63  ;;  %v527_v5 = vmul.f32 %v493_v13, %v976_v35 }
 0x31a   :  { %552 = vst [vmem:[#allocation5 + $0xb0] sm:$0xff] %v520_v45  ;;  %553 = vst [vmem:[#allocation5 + $0xb8] sm:$0xff] %v521_v62 }
 0x31b   :  { %558 = vst [vmem:[#allocation5 + $0xe0] sm:$0xff] %v526_v16  ;;  %559 = vst [vmem:[#allocation5 + $0xe8] sm:$0xff] %v527_v5  ;;  %v489_v6 = vpop.permute.xlu1 %488 }
 0x31c   :  { %v524_v25 = vmul.f32 %v489_v6, %v977_v24  ;;  %v525_v10 = vmul.f32 %v489_v6, %v978_v40 }
 0x31e   :  { %556 = vst [vmem:[#allocation5 + $0xd0] sm:$0xff] %v524_v25  ;;  %557 = vst [vmem:[#allocation5 + $0xd8] sm:$0xff] %v525_v10 }
 0x31f   :  { %v497_v18 = vpop.permute.xlu1 %496 }
 0x320   :  { %v528_v46 = vmul.f32 %v497_v18, %v979_v41  ;;  %v529_v17 = vmul.f32 %v497_v18, %v980_v11 }
 0x322   :  { %560 = vst [vmem:[#allocation5 + $0xf0] sm:$0xff] %v528_v46  ;;  %561 = vst [vmem:[#allocation5 + $0xf8] sm:$0xff] %v529_v17 }
 0x323   :  { %686 = shalt.err (!%p683_p12)
}
 0x324   :  { %s687_s19 = scalar_lea.hbm %s957_s3, 4096 }
 0x325   :  { %p688_p13 = scmp.ne.s32.totalorder %s957_s3, %s687_s19  ;;  %p691_p0 = scmp.lt.u32.totalorder %s687_s19, %s957_s3 }
 0x327   :  { %p693_p1 = pnand %p691_p0, %p688_p13 }
 0x329   :  { %696 = shalt.err (!%p693_p1)
}
 0x32a   :  { %573 = dma.vmem_to_hbm [thread:$0]  %s568_s15, 4096, %s957_s3, [#allocation4], %s702_s22, %s702_s22, %s703_s23  }
 0x32b   :  { %699 = dma.done.wait [#allocation4], 4096  }
 0x32c   :  { %700 = vsyncadd [#allocation4], 4294963200 }
 0x32d   :  { %577 = vsyncpa [#allocation3], 1 }
 0x32e   :  { %578 = vsyncpa [#allocation4], 1 }

</bundles_post_ra>
